<compile_context>
chip_gen: v7x
topology: tpu7x:2x2x1
jax: 0.10.0
libtpu: 0.0.40
codegen_flags: <defaults>
</compile_context>

<pallas_src>
import jax
import jax.numpy as jnp
from jax.experimental import pallas as pl
from jax.experimental.pallas import tpu as pltpu


def _identity_kernel(x_ref, o_ref):
    # Identity forward pass: straight VMEM copy of the whole slab.
    o_ref[...] = x_ref[...]


@jax.jit
def dummy_transformer_block(x):
    """Identity forward of DummyTransformerBlock as a single-block Pallas copy."""
    B, S, E = x.shape
    # (2, 4, 768) -> (8, 768): (8, 128)-aligned, lane-dense slab.
    x2d = x.reshape(B * S, E)
    y2d = pl.pallas_call(
        _identity_kernel,
        out_shape=jax.ShapeDtypeStruct(x2d.shape, x2d.dtype),
        in_specs=[pl.BlockSpec(memory_space=pltpu.MemorySpace.VMEM)],
        out_specs=pl.BlockSpec(memory_space=pltpu.MemorySpace.VMEM),
        input_output_aliases={0: 0},
    )(x2d)
    return y2d.reshape(B, S, E)


if __name__ == "__main__":
    key = jax.random.PRNGKey(0)
    # Matches the reference script's input: torch.rand(2, 4, 768)
    x = jax.random.uniform(key, (2, 4, 768), dtype=jnp.float32)

    y = dummy_transformer_block(x)
    jax.block_until_ready(y)

    assert y.shape == x.shape and y.dtype == x.dtype
    assert bool(jnp.all(y == x))
    print("KERNEL_OK")
</pallas_src>

<mosaic_0001>
module attributes {stable_mosaic.version = 11 : i64} {
  func.func @_identity_kernel(%arg0: memref<8x768xf32, #tpu.memory_space<vmem>>, %arg1: memref<8x768xf32, #tpu.memory_space<vmem>>) attributes {dimension_semantics = [], scalar_prefetch = 0 : i64, scratch_operands = 0 : i64, tpu.core_type = #tpu.core_type<tc>} {
    %c0 = arith.constant 0 : index
    %c0_0 = arith.constant 0 : index
    %0 = vector.load %arg0[%c0, %c0_0] : memref<8x768xf32, #tpu.memory_space<vmem>>, vector<8x768xf32>
    %c0_1 = arith.constant 0 : index
    %c0_2 = arith.constant 0 : index
    %1 = vector.load %arg1[%c0_1, %c0_2] : memref<8x768xf32, #tpu.memory_space<vmem>>, vector<8x768xf32>
    tpu.vector_store %arg1[%c0_1, %c0_2], %0 {strides = array<i32>} : memref<8x768xf32, #tpu.memory_space<vmem>>, vector<8x768xf32>,
    return
  }
}

</mosaic_0001>

<bundles_post_ra>
// kernel: dummy_transformer_block.1
= control target key start
LH: loop header
LB: loop body
LE: loop exit
PB: predicated region body
PF: predicated region fallthrough
CT: control target
= control target key end

     0   :  { %s70_s0 = inlined_call_operand.vmem [shape: f32[8,768], index: 0, kind: input, shape index: {}, may-alias: {0,1}]   ;;  %s71_s1 = inlined_call_operand.vmem [shape: f32[8,768], index: 1, kind: output, shape index: {}, may-alias: {0,1}]  }
   0x1   :  { %v8_v0 = vld [vmem:[%s70_s0] sm:$0xff]  ;;  %v9_v1 = vld [vmem:[%s70_s0 + $0x8] sm:$0xff]  ;;  %v10_v2 = vld [vmem:[%s70_s0 + $0x10] sm:$0xff] }
   0x2   :  { %14 = vst [vmem:[%s71_s1] sm:$0xff] %v8_v0  ;;  %15 = vst [vmem:[%s71_s1 + $0x8] sm:$0xff] %v9_v1 }
   0x3   :  { %16 = vst [vmem:[%s71_s1 + $0x10] sm:$0xff] %v10_v2 }
   0xa   :  { %v11_v3 = vld [vmem:[%s70_s0 + $0x18] sm:$0xff]  ;;  %v12_v4 = vld [vmem:[%s70_s0 + $0x20] sm:$0xff]  ;;  %v13_v5 = vld [vmem:[%s70_s0 + $0x28] sm:$0xff] }
   0xb   :  { %17 = vst [vmem:[%s71_s1 + $0x18] sm:$0xff] %v11_v3  ;;  %18 = vst [vmem:[%s71_s1 + $0x20] sm:$0xff] %v12_v4 }
   0xc   :  { %19 = vst [vmem:[%s71_s1 + $0x28] sm:$0xff] %v13_v5 }

</bundles_post_ra>
